<compile_context>
chip_gen: v5e
topology: v5e:2x2
jax: 0.10.0
libtpu: 0.0.40
codegen_flags: <defaults>
</compile_context>

<pallas_src>
import functools
import math

import jax
import jax.numpy as jnp
import numpy as np
from jax.experimental import pallas as pl
from jax.experimental.pallas import tpu as pltpu


def _mha_body(xq, xk, xv, wq_ref, wk_ref, wv_ref, wp_ref, out_ref, o_scratch,
              *, head_num):
    """Shared multi-head attention body.

    xq : (tq, D) f32      wq/wk/wv_ref : (D, H*Hd) bf16 (scale folded into wq)
    xk : (Lk, D) f32      wp_ref       : (D, D)    bf16 (proj_w.T)
    xv : (Lk, D) f32      out_ref      : (1, tq, D)
    o_scratch : (tq, D) f32 VMEM buffer for the head-concatenated attention.
    """
    H = head_num
    Hd = wq_ref.shape[1] // H

    xq_b = xq.astype(jnp.bfloat16)
    xk_b = xk.astype(jnp.bfloat16)
    xv_b = xv.astype(jnp.bfloat16)

    # Lane-dense fused projections for all heads (bf16 MXU in, f32 accumulate).
    q = jnp.dot(xq_b, wq_ref[...], preferred_element_type=jnp.float32)  # (tq, D)
    k = jnp.dot(xk_b, wk_ref[...], preferred_element_type=jnp.float32)  # (Lk, D)
    v = jnp.dot(xv_b, wv_ref[...], preferred_element_type=jnp.float32)  # (Lk, D)

    q_b = q.astype(jnp.bfloat16)
    k_b = k.astype(jnp.bfloat16)
    v_b = v.astype(jnp.bfloat16)

    for h in range(H):                              # unrolled per-head attention
        cols = slice(h * Hd, (h + 1) * Hd)
        qh, kh, vh = q_b[:, cols], k_b[:, cols], v_b[:, cols]

        # q @ k^T without materializing a transpose: contract last dims.
        s = jax.lax.dot_general(
            qh, kh, dimension_numbers=(((1,), (1,)), ((), ())),
            preferred_element_type=jnp.float32)                    # (tq, Lk) f32

        # Numerically stable softmax in f32; reciprocal runs on the EUP slot.
        s = s - jnp.max(s, axis=-1, keepdims=True)
        e = jnp.exp(s)
        inv = pl.reciprocal(jnp.sum(e, axis=-1, keepdims=True), approx=True)
        a = (e * inv).astype(jnp.bfloat16)

        # Head output lands in its column block of the concat buffer.
        o_scratch[:, cols] = jnp.dot(a, vh, preferred_element_type=jnp.float32)

    # Lane-dense output projection over the concatenated heads.
    o = o_scratch[...].astype(jnp.bfloat16)                        # (tq, D)
    out_ref[0] = jnp.dot(o, wp_ref[...],
                         preferred_element_type=jnp.float32).astype(out_ref.dtype)


def _self_attention_kernel(xq_ref, xk_ref, xv_ref,
                           wq_ref, wk_ref, wv_ref, wp_ref,
                           out_ref, o_scratch, *, head_num):
    """General (cross-attention) path: distinct X_Q / X_K / X_V tensors."""
    _mha_body(xq_ref[0], xk_ref[0], xv_ref[0],
              wq_ref, wk_ref, wv_ref, wp_ref, out_ref, o_scratch,
              head_num=head_num)


def _self_attention_kernel_shared(x_ref, wq_ref, wk_ref, wv_ref, wp_ref,
                                  out_ref, o_scratch, *, head_num, q_tile):
    """True self-attention path: X_Q is X_K is X_V -> one activation DMA."""
    i = pl.program_id(1)
    x2 = x_ref.at[0]                       # (L, D) ref view, resident per batch
    x_full = x2[...]
    start = pl.multiple_of(i * q_tile, q_tile)
    xq = x2[pl.ds(start, q_tile), :]       # current query tile
    _mha_body(xq, x_full, x_full,
              wq_ref, wk_ref, wv_ref, wp_ref, out_ref, o_scratch,
              head_num=head_num)


def _pick_q_tile(length, cap):
    """Largest divisor of `length` that is <= cap and a multiple of 8."""
    if length <= cap:
        return length
    for t in range(cap - cap % 8, 7, -8):
        if length % t == 0:
            return t
    return length


def self_attention(xq, xk, xv, w_q, w_k, w_v, proj_w, *, max_q_tile=256):
    """Pallas-backed forward pass matching SelfAttention.forward."""
    B, Lq, D = xq.shape
    _, Lk, _ = xk.shape
    H, Dw, Hd = w_q.shape
    assert Dw == D and H * Hd == D, "head_num * hidden_dim must equal input_dim"
    assert proj_w.shape == (D, D)

    scale = 1.0 / math.sqrt(Hd)

    # Fuse all per-head weights into lane-dense (D, H*Hd) blocks; fold the
    # softmax scale into W_Q; pre-transpose the output projection.  Cast to
    # bf16 once on the host so the kernel's MXU inputs are bf16 (f32 acc).
    wq_flat = (jnp.transpose(w_q, (1, 0, 2)).reshape(D, H * Hd) * scale
               ).astype(jnp.bfloat16)
    wk_flat = jnp.transpose(w_k, (1, 0, 2)).reshape(D, H * Hd).astype(jnp.bfloat16)
    wv_flat = jnp.transpose(w_v, (1, 0, 2)).reshape(D, H * Hd).astype(jnp.bfloat16)
    wp = proj_w.T.astype(jnp.bfloat16)                       # out = att @ proj_w.T

    tq = _pick_q_tile(Lq, max_q_tile)
    nq = Lq // tq
    grid = (B, nq)

    # Weight index_maps are grid-invariant -> DMA'd once, VMEM-resident.
    weight_specs = [
        pl.BlockSpec((D, D), lambda b, i: (0, 0)),   # fused W_Q (scaled)
        pl.BlockSpec((D, D), lambda b, i: (0, 0)),   # fused W_K
        pl.BlockSpec((D, D), lambda b, i: (0, 0)),   # fused W_V
        pl.BlockSpec((D, D), lambda b, i: (0, 0)),   # proj_w.T
    ]
    out_spec = pl.BlockSpec((1, tq, D), lambda b, i: (b, i, 0))
    compiler_params = pltpu.CompilerParams(
        dimension_semantics=("parallel", "parallel"),
        vmem_limit_bytes=32 * 1024 * 1024,   # conservative across v5e/v6e/v7x
    )

    shared = (xk is xq) and (xv is xq)
    if shared:
        kernel = functools.partial(_self_attention_kernel_shared,
                                   head_num=H, q_tile=tq)
        in_specs = [pl.BlockSpec((1, Lq, D), lambda b, i: (b, 0, 0))] + weight_specs
        args = (xq, wq_flat, wk_flat, wv_flat, wp)
    else:
        kernel = functools.partial(_self_attention_kernel, head_num=H)
        in_specs = [
            pl.BlockSpec((1, tq, D), lambda b, i: (b, i, 0)),   # X_Q tile
            pl.BlockSpec((1, Lk, D), lambda b, i: (b, 0, 0)),   # X_K (per batch)
            pl.BlockSpec((1, Lk, D), lambda b, i: (b, 0, 0)),   # X_V (per batch)
        ] + weight_specs
        args = (xq, xk, xv, wq_flat, wk_flat, wv_flat, wp)

    return pl.pallas_call(
        kernel,
        out_shape=jax.ShapeDtypeStruct((B, Lq, D), xq.dtype),
        grid_spec=pltpu.PrefetchScalarGridSpec(
            num_scalar_prefetch=0,
            grid=grid,
            in_specs=in_specs,
            out_specs=out_spec,
            scratch_shapes=[pltpu.VMEM((tq, D), jnp.float32)],
        ),
        compiler_params=compiler_params,
    )(*args)


def _reference(xq, xk, xv, w_q, w_k, w_v, proj_w):
    """Pure-f32 JAX mirror of the PyTorch forward."""
    H, D, Hd = w_q.shape
    q = jnp.einsum('bld,hde->hble', xq, w_q)
    k = jnp.einsum('bld,hde->hble', xk, w_k)
    v = jnp.einsum('bld,hde->hble', xv, w_v)
    s = jnp.einsum('hbqe,hbke->hbqk', q, k) / math.sqrt(Hd)
    a = jax.nn.softmax(s, axis=-1)
    o = jnp.einsum('hbqk,hbke->hbqe', a, v)                       # (H, B, Lq, Hd)
    att = jnp.concatenate([o[h] for h in range(H)], axis=-1)      # (B, Lq, D)
    return att @ proj_w.T


def _reference_mixed(xq, xk, xv, w_q, w_k, w_v, proj_w):
    """Mirror of the kernel's precision: bf16 MXU inputs, f32 accumulation."""
    H, D, Hd = w_q.shape
    bf16, f32 = jnp.bfloat16, jnp.float32
    scale = 1.0 / math.sqrt(Hd)

    wq = (jnp.transpose(w_q, (1, 0, 2)).reshape(D, H * Hd) * scale).astype(bf16)
    wk = jnp.transpose(w_k, (1, 0, 2)).reshape(D, H * Hd).astype(bf16)
    wv = jnp.transpose(w_v, (1, 0, 2)).reshape(D, H * Hd).astype(bf16)
    wp = proj_w.T.astype(bf16)

    q = jnp.einsum('bld,de->ble', xq.astype(bf16), wq,
                   preferred_element_type=f32).astype(bf16)
    k = jnp.einsum('bld,de->ble', xk.astype(bf16), wk,
                   preferred_element_type=f32).astype(bf16)
    v = jnp.einsum('bld,de->ble', xv.astype(bf16), wv,
                   preferred_element_type=f32).astype(bf16)

    B, Lq_, _ = q.shape
    Lk_ = k.shape[1]
    q = q.reshape(B, Lq_, H, Hd)
    k = k.reshape(B, Lk_, H, Hd)
    v = v.reshape(B, Lk_, H, Hd)

    s = jnp.einsum('bqhe,bkhe->bhqk', q, k, preferred_element_type=f32)
    s = s - jnp.max(s, axis=-1, keepdims=True)
    e = jnp.exp(s)
    a = (e / jnp.sum(e, axis=-1, keepdims=True)).astype(bf16)
    o = jnp.einsum('bhqk,bkhe->bqhe', a, v, preferred_element_type=f32)
    o = o.reshape(B, Lq_, H * Hd).astype(bf16)
    return jnp.einsum('bqd,de->bqe', o, wp, preferred_element_type=f32)


if __name__ == "__main__":
    B, Lq, Lk, D, H = 2, 8, 8, 32, 4
    Hd = D // H

    key = jax.random.PRNGKey(0)
    ks = jax.random.split(key, 7)

    xq = jax.random.normal(ks[0], (B, Lq, D), dtype=jnp.float32)
    xk = jax.random.normal(ks[1], (B, Lk, D), dtype=jnp.float32)
    xv = jax.random.normal(ks[2], (B, Lk, D), dtype=jnp.float32)

    bound = 1.0 / math.sqrt(Hd)              # matches reset_parameters()
    w_q = jax.random.uniform(ks[3], (H, D, Hd), jnp.float32, -bound, bound)
    w_k = jax.random.uniform(ks[4], (H, D, Hd), jnp.float32, -bound, bound)
    w_v = jax.random.uniform(ks[5], (H, D, Hd), jnp.float32, -bound, bound)

    pbound = 1.0 / math.sqrt(D)              # nn.Linear default uniform range
    proj_w = jax.random.uniform(ks[6], (D, D), jnp.float32, -pbound, pbound)

    # --- Cross-attention path (distinct Q/K/V inputs) ---
    out = jax.block_until_ready(self_attention(xq, xk, xv, w_q, w_k, w_v, proj_w))
    ref_mixed = _reference_mixed(xq, xk, xv, w_q, w_k, w_v, proj_w)
    ref_f32 = _reference(xq, xk, xv, w_q, w_k, w_v, proj_w)
    # Tight check against a reference mirroring the kernel's bf16/f32 precision.
    np.testing.assert_allclose(np.asarray(out), np.asarray(ref_mixed),
                               rtol=5e-3, atol=5e-3)
    # Looser check against the pure-f32 module semantics (bf16 MXU inputs).
    np.testing.assert_allclose(np.asarray(out), np.asarray(ref_f32),
                               rtol=5e-2, atol=5e-2)

    # --- True self-attention path (shared input -> single activation DMA) ---
    out_s = jax.block_until_ready(self_attention(xq, xq, xq, w_q, w_k, w_v, proj_w))
    ref_s_mixed = _reference_mixed(xq, xq, xq, w_q, w_k, w_v, proj_w)
    np.testing.assert_allclose(np.asarray(out_s), np.asarray(ref_s_mixed),
                               rtol=5e-3, atol=5e-3)

    print("KERNEL_OK")
</pallas_src>

<mosaic_0001>
module attributes {stable_mosaic.version = 11 : i64} {
  func.func @_self_attention_kernel(%arg0: i32, %arg1: i32, %arg2: memref<1x8x32xf32, #tpu.memory_space<vmem>>, %arg3: memref<1x8x32xf32, #tpu.memory_space<vmem>>, %arg4: memref<1x8x32xf32, #tpu.memory_space<vmem>>, %arg5: memref<32x32xbf16, #tpu.memory_space<vmem>>, %arg6: memref<32x32xbf16, #tpu.memory_space<vmem>>, %arg7: memref<32x32xbf16, #tpu.memory_space<vmem>>, %arg8: memref<32x32xbf16, #tpu.memory_space<vmem>>, %arg9: memref<1x8x32xf32, #tpu.memory_space<vmem>>, %arg10: memref<8x32xf32, #tpu.memory_space<vmem>>) attributes {dimension_semantics = [#tpu.dimension_semantics<parallel>, #tpu.dimension_semantics<parallel>], iteration_bounds = array<i64: 2, 1>, scalar_prefetch = 0 : i64, scratch_operands = 1 : i64, tpu.core_type = #tpu.core_type<tc>, window_params = [{transform_indices = @transform_0, window_bounds = array<i64: 1, 8, 32>}, {transform_indices = @transform_1, window_bounds = array<i64: 1, 8, 32>}, {transform_indices = @transform_2, window_bounds = array<i64: 1, 8, 32>}, {pipeline_mode = #tpu.pipeline_mode<synchronous>, transform_indices = @transform_3, window_bounds = array<i64: 32, 32>}, {pipeline_mode = #tpu.pipeline_mode<synchronous>, transform_indices = @transform_4, window_bounds = array<i64: 32, 32>}, {pipeline_mode = #tpu.pipeline_mode<synchronous>, transform_indices = @transform_5, window_bounds = array<i64: 32, 32>}, {pipeline_mode = #tpu.pipeline_mode<synchronous>, transform_indices = @transform_6, window_bounds = array<i64: 32, 32>}, {transform_indices = @transform_7, window_bounds = array<i64: 1, 8, 32>}]} {
    %c0 = arith.constant 0 : index
    %c0_0 = arith.constant 0 : index
    %c0_1 = arith.constant 0 : index
    %0 = vector.load %arg2[%c0, %c0_0, %c0_1] : memref<1x8x32xf32, #tpu.memory_space<vmem>>, vector<1x8x32xf32>
    %1 = vector.shape_cast %0 : vector<1x8x32xf32> to vector<8x32xf32>
    %c0_2 = arith.constant 0 : index
    %c0_3 = arith.constant 0 : index
    %c0_4 = arith.constant 0 : index
    %2 = vector.load %arg3[%c0_2, %c0_3, %c0_4] : memref<1x8x32xf32, #tpu.memory_space<vmem>>, vector<1x8x32xf32>
    %3 = vector.shape_cast %2 : vector<1x8x32xf32> to vector<8x32xf32>
    %c0_5 = arith.constant 0 : index
    %c0_6 = arith.constant 0 : index
    %c0_7 = arith.constant 0 : index
    %4 = vector.load %arg4[%c0_5, %c0_6, %c0_7] : memref<1x8x32xf32, #tpu.memory_space<vmem>>, vector<1x8x32xf32>
    %5 = vector.shape_cast %4 : vector<1x8x32xf32> to vector<8x32xf32>
    %6 = arith.truncf %1 : vector<8x32xf32> to vector<8x32xbf16>
    %7 = arith.truncf %3 : vector<8x32xf32> to vector<8x32xbf16>
    %8 = arith.truncf %5 : vector<8x32xf32> to vector<8x32xbf16>
    %c0_8 = arith.constant 0 : index
    %c0_9 = arith.constant 0 : index
    %9 = vector.load %arg5[%c0_8, %c0_9] : memref<32x32xbf16, #tpu.memory_space<vmem>>, vector<32x32xbf16>
    %cst = arith.constant dense<0.000000e+00> : vector<8x32xf32>
    %10 = tpu.matmul %6, %9, %cst {dimension_numbers = #tpu.dot_dimension_numbers<[1], [0], [0], [1], [0, 0, 1, 1], [], []>} : vector<8x32xbf16>, vector<32x32xbf16>, vector<8x32xf32> -> vector<8x32xf32>
    %c0_10 = arith.constant 0 : index
    %c0_11 = arith.constant 0 : index
    %11 = vector.load %arg6[%c0_10, %c0_11] : memref<32x32xbf16, #tpu.memory_space<vmem>>, vector<32x32xbf16>
    %cst_12 = arith.constant dense<0.000000e+00> : vector<8x32xf32>
    %12 = tpu.matmul %7, %11, %cst_12 {dimension_numbers = #tpu.dot_dimension_numbers<[1], [0], [0], [1], [0, 0, 1, 1], [], []>} : vector<8x32xbf16>, vector<32x32xbf16>, vector<8x32xf32> -> vector<8x32xf32>
    %c0_13 = arith.constant 0 : index
    %c0_14 = arith.constant 0 : index
    %13 = vector.load %arg7[%c0_13, %c0_14] : memref<32x32xbf16, #tpu.memory_space<vmem>>, vector<32x32xbf16>
    %cst_15 = arith.constant dense<0.000000e+00> : vector<8x32xf32>
    %14 = tpu.matmul %8, %13, %cst_15 {dimension_numbers = #tpu.dot_dimension_numbers<[1], [0], [0], [1], [0, 0, 1, 1], [], []>} : vector<8x32xbf16>, vector<32x32xbf16>, vector<8x32xf32> -> vector<8x32xf32>
    %15 = arith.truncf %10 : vector<8x32xf32> to vector<8x32xbf16>
    %16 = arith.truncf %12 : vector<8x32xf32> to vector<8x32xbf16>
    %17 = arith.truncf %14 : vector<8x32xf32> to vector<8x32xbf16>
    %18 = vector.extract_strided_slice %15 {offsets = [0, 0], sizes = [8, 8], strides = [1, 1]} : vector<8x32xbf16> to vector<8x8xbf16>
    %19 = vector.extract_strided_slice %16 {offsets = [0, 0], sizes = [8, 8], strides = [1, 1]} : vector<8x32xbf16> to vector<8x8xbf16>
    %20 = vector.extract_strided_slice %17 {offsets = [0, 0], sizes = [8, 8], strides = [1, 1]} : vector<8x32xbf16> to vector<8x8xbf16>
    %cst_16 = arith.constant dense<0.000000e+00> : vector<8x8xf32>
    %21 = tpu.matmul %18, %19, %cst_16 {dimension_numbers = #tpu.dot_dimension_numbers<[1], [1], [0], [0], [0, 0, 1, 0], [], []>} : vector<8x8xbf16>, vector<8x8xbf16>, vector<8x8xf32> -> vector<8x8xf32>
    %cst_17 = arith.constant dense<0xFF800000> : vector<8xf32>
    %22 = vector.multi_reduction <maximumf>, %21, %cst_17 [1] : vector<8x8xf32> to vector<8xf32>
    %23 = vector.shape_cast %22 : vector<8xf32> to vector<8x1xf32>
    %24 = vector.broadcast %23 : vector<8x1xf32> to vector<8x8xf32>
    %25 = arith.subf %21, %24 : vector<8x8xf32>
    %26 = math.exp %25 : vector<8x8xf32>
    %cst_18 = arith.constant dense<0.000000e+00> : vector<8xf32>
    %27 = vector.multi_reduction <add>, %26, %cst_18 [1] : vector<8x8xf32> to vector<8xf32>
    %28 = vector.shape_cast %27 : vector<8xf32> to vector<8x1xf32>
    %29 = tpu.reciprocal %28 {approx = true} : vector<8x1xf32> -> vector<8x1xf32>
    %30 = vector.broadcast %29 : vector<8x1xf32> to vector<8x8xf32>
    %31 = arith.mulf %26, %30 : vector<8x8xf32>
    %32 = arith.truncf %31 : vector<8x8xf32> to vector<8x8xbf16>
    %cst_19 = arith.constant dense<0.000000e+00> : vector<8x8xf32>
    %33 = tpu.matmul %32, %20, %cst_19 {dimension_numbers = #tpu.dot_dimension_numbers<[1], [0], [0], [1], [0, 0, 1, 1], [], []>} : vector<8x8xbf16>, vector<8x8xbf16>, vector<8x8xf32> -> vector<8x8xf32>
    %c0_20 = arith.constant 0 : index
    %c0_21 = arith.constant 0 : index
    %34 = vector.load %arg10[%c0_20, %c0_21] : memref<8x32xf32, #tpu.memory_space<vmem>>, vector<8x8xf32>
    tpu.vector_store %arg10[%c0_20, %c0_21], %33 {strides = array<i32>} : memref<8x32xf32, #tpu.memory_space<vmem>>, vector<8x8xf32>,
    %35 = vector.extract_strided_slice %15 {offsets = [0, 8], sizes = [8, 8], strides = [1, 1]} : vector<8x32xbf16> to vector<8x8xbf16>
    %36 = vector.extract_strided_slice %16 {offsets = [0, 8], sizes = [8, 8], strides = [1, 1]} : vector<8x32xbf16> to vector<8x8xbf16>
    %37 = vector.extract_strided_slice %17 {offsets = [0, 8], sizes = [8, 8], strides = [1, 1]} : vector<8x32xbf16> to vector<8x8xbf16>
    %cst_22 = arith.constant dense<0.000000e+00> : vector<8x8xf32>
    %38 = tpu.matmul %35, %36, %cst_22 {dimension_numbers = #tpu.dot_dimension_numbers<[1], [1], [0], [0], [0, 0, 1, 0], [], []>} : vector<8x8xbf16>, vector<8x8xbf16>, vector<8x8xf32> -> vector<8x8xf32>
    %cst_23 = arith.constant dense<0xFF800000> : vector<8xf32>
    %39 = vector.multi_reduction <maximumf>, %38, %cst_23 [1] : vector<8x8xf32> to vector<8xf32>
    %40 = vector.shape_cast %39 : vector<8xf32> to vector<8x1xf32>
    %41 = vector.broadcast %40 : vector<8x1xf32> to vector<8x8xf32>
    %42 = arith.subf %38, %41 : vector<8x8xf32>
    %43 = math.exp %42 : vector<8x8xf32>
    %cst_24 = arith.constant dense<0.000000e+00> : vector<8xf32>
    %44 = vector.multi_reduction <add>, %43, %cst_24 [1] : vector<8x8xf32> to vector<8xf32>
    %45 = vector.shape_cast %44 : vector<8xf32> to vector<8x1xf32>
    %46 = tpu.reciprocal %45 {approx = true} : vector<8x1xf32> -> vector<8x1xf32>
    %47 = vector.broadcast %46 : vector<8x1xf32> to vector<8x8xf32>
    %48 = arith.mulf %43, %47 : vector<8x8xf32>
    %49 = arith.truncf %48 : vector<8x8xf32> to vector<8x8xbf16>
    %cst_25 = arith.constant dense<0.000000e+00> : vector<8x8xf32>
    %50 = tpu.matmul %49, %37, %cst_25 {dimension_numbers = #tpu.dot_dimension_numbers<[1], [0], [0], [1], [0, 0, 1, 1], [], []>} : vector<8x8xbf16>, vector<8x8xbf16>, vector<8x8xf32> -> vector<8x8xf32>
    %c0_26 = arith.constant 0 : index
    %c8 = arith.constant 8 : index
    %51 = vector.load %arg10[%c0_26, %c8] : memref<8x32xf32, #tpu.memory_space<vmem>>, vector<8x8xf32>
    tpu.vector_store %arg10[%c0_26, %c8], %50 {strides = array<i32>} : memref<8x32xf32, #tpu.memory_space<vmem>>, vector<8x8xf32>,
    %52 = vector.extract_strided_slice %15 {offsets = [0, 16], sizes = [8, 8], strides = [1, 1]} : vector<8x32xbf16> to vector<8x8xbf16>
    %53 = vector.extract_strided_slice %16 {offsets = [0, 16], sizes = [8, 8], strides = [1, 1]} : vector<8x32xbf16> to vector<8x8xbf16>
    %54 = vector.extract_strided_slice %17 {offsets = [0, 16], sizes = [8, 8], strides = [1, 1]} : vector<8x32xbf16> to vector<8x8xbf16>
    %cst_27 = arith.constant dense<0.000000e+00> : vector<8x8xf32>
    %55 = tpu.matmul %52, %53, %cst_27 {dimension_numbers = #tpu.dot_dimension_numbers<[1], [1], [0], [0], [0, 0, 1, 0], [], []>} : vector<8x8xbf16>, vector<8x8xbf16>, vector<8x8xf32> -> vector<8x8xf32>
    %cst_28 = arith.constant dense<0xFF800000> : vector<8xf32>
    %56 = vector.multi_reduction <maximumf>, %55, %cst_28 [1] : vector<8x8xf32> to vector<8xf32>
    %57 = vector.shape_cast %56 : vector<8xf32> to vector<8x1xf32>
    %58 = vector.broadcast %57 : vector<8x1xf32> to vector<8x8xf32>
    %59 = arith.subf %55, %58 : vector<8x8xf32>
    %60 = math.exp %59 : vector<8x8xf32>
    %cst_29 = arith.constant dense<0.000000e+00> : vector<8xf32>
    %61 = vector.multi_reduction <add>, %60, %cst_29 [1] : vector<8x8xf32> to vector<8xf32>
    %62 = vector.shape_cast %61 : vector<8xf32> to vector<8x1xf32>
    %63 = tpu.reciprocal %62 {approx = true} : vector<8x1xf32> -> vector<8x1xf32>
    %64 = vector.broadcast %63 : vector<8x1xf32> to vector<8x8xf32>
    %65 = arith.mulf %60, %64 : vector<8x8xf32>
    %66 = arith.truncf %65 : vector<8x8xf32> to vector<8x8xbf16>
    %cst_30 = arith.constant dense<0.000000e+00> : vector<8x8xf32>
    %67 = tpu.matmul %66, %54, %cst_30 {dimension_numbers = #tpu.dot_dimension_numbers<[1], [0], [0], [1], [0, 0, 1, 1], [], []>} : vector<8x8xbf16>, vector<8x8xbf16>, vector<8x8xf32> -> vector<8x8xf32>
    %c0_31 = arith.constant 0 : index
    %c16 = arith.constant 16 : index
    %68 = vector.load %arg10[%c0_31, %c16] : memref<8x32xf32, #tpu.memory_space<vmem>>, vector<8x8xf32>
    tpu.vector_store %arg10[%c0_31, %c16], %67 {strides = array<i32>} : memref<8x32xf32, #tpu.memory_space<vmem>>, vector<8x8xf32>,
    %69 = vector.extract_strided_slice %15 {offsets = [0, 24], sizes = [8, 8], strides = [1, 1]} : vector<8x32xbf16> to vector<8x8xbf16>
    %70 = vector.extract_strided_slice %16 {offsets = [0, 24], sizes = [8, 8], strides = [1, 1]} : vector<8x32xbf16> to vector<8x8xbf16>
    %71 = vector.extract_strided_slice %17 {offsets = [0, 24], sizes = [8, 8], strides = [1, 1]} : vector<8x32xbf16> to vector<8x8xbf16>
    %cst_32 = arith.constant dense<0.000000e+00> : vector<8x8xf32>
    %72 = tpu.matmul %69, %70, %cst_32 {dimension_numbers = #tpu.dot_dimension_numbers<[1], [1], [0], [0], [0, 0, 1, 0], [], []>} : vector<8x8xbf16>, vector<8x8xbf16>, vector<8x8xf32> -> vector<8x8xf32>
    %cst_33 = arith.constant dense<0xFF800000> : vector<8xf32>
    %73 = vector.multi_reduction <maximumf>, %72, %cst_33 [1] : vector<8x8xf32> to vector<8xf32>
    %74 = vector.shape_cast %73 : vector<8xf32> to vector<8x1xf32>
    %75 = vector.broadcast %74 : vector<8x1xf32> to vector<8x8xf32>
    %76 = arith.subf %72, %75 : vector<8x8xf32>
    %77 = math.exp %76 : vector<8x8xf32>
    %cst_34 = arith.constant dense<0.000000e+00> : vector<8xf32>
    %78 = vector.multi_reduction <add>, %77, %cst_34 [1] : vector<8x8xf32> to vector<8xf32>
    %79 = vector.shape_cast %78 : vector<8xf32> to vector<8x1xf32>
    %80 = tpu.reciprocal %79 {approx = true} : vector<8x1xf32> -> vector<8x1xf32>
    %81 = vector.broadcast %80 : vector<8x1xf32> to vector<8x8xf32>
    %82 = arith.mulf %77, %81 : vector<8x8xf32>
    %83 = arith.truncf %82 : vector<8x8xf32> to vector<8x8xbf16>
    %cst_35 = arith.constant dense<0.000000e+00> : vector<8x8xf32>
    %84 = tpu.matmul %83, %71, %cst_35 {dimension_numbers = #tpu.dot_dimension_numbers<[1], [0], [0], [1], [0, 0, 1, 1], [], []>} : vector<8x8xbf16>, vector<8x8xbf16>, vector<8x8xf32> -> vector<8x8xf32>
    %c0_36 = arith.constant 0 : index
    %c24 = arith.constant 24 : index
    %85 = vector.load %arg10[%c0_36, %c24] : memref<8x32xf32, #tpu.memory_space<vmem>>, vector<8x8xf32>
    tpu.vector_store %arg10[%c0_36, %c24], %84 {strides = array<i32>} : memref<8x32xf32, #tpu.memory_space<vmem>>, vector<8x8xf32>,
    %c0_37 = arith.constant 0 : index
    %c0_38 = arith.constant 0 : index
    %86 = vector.load %arg10[%c0_37, %c0_38] : memref<8x32xf32, #tpu.memory_space<vmem>>, vector<8x32xf32>
    %87 = arith.truncf %86 : vector<8x32xf32> to vector<8x32xbf16>
    %c0_39 = arith.constant 0 : index
    %c0_40 = arith.constant 0 : index
    %88 = vector.load %arg8[%c0_39, %c0_40] : memref<32x32xbf16, #tpu.memory_space<vmem>>, vector<32x32xbf16>
    %cst_41 = arith.constant dense<0.000000e+00> : vector<8x32xf32>
    %89 = tpu.matmul %87, %88, %cst_41 {dimension_numbers = #tpu.dot_dimension_numbers<[1], [0], [0], [1], [0, 0, 1, 1], [], []>} : vector<8x32xbf16>, vector<32x32xbf16>, vector<8x32xf32> -> vector<8x32xf32>
    %c0_42 = arith.constant 0 : index
    %c0_43 = arith.constant 0 : index
    %c0_44 = arith.constant 0 : index
    %90 = vector.load %arg9[%c0_42, %c0_43, %c0_44] : memref<1x8x32xf32, #tpu.memory_space<vmem>>, vector<1x8x32xf32>
    %91 = vector.shape_cast %90 : vector<1x8x32xf32> to vector<8x32xf32>
    %92 = vector.shape_cast %89 : vector<8x32xf32> to vector<1x8x32xf32>
    tpu.vector_store %arg9[%c0_42, %c0_43, %c0_44], %92 {strides = array<i32>} : memref<1x8x32xf32, #tpu.memory_space<vmem>>, vector<1x8x32xf32>,
    return
  }
  func.func @transform_0(%arg0: i32, %arg1: i32) -> (i32, i32, i32) {
    %c0_i32 = arith.constant 0 : i32
    %c0_i32_0 = arith.constant 0 : i32
    return %arg0, %arg1, %c0_i32 : i32, i32, i32
  }
  func.func @transform_1(%arg0: i32, %arg1: i32) -> (i32, i32, i32) {
    %c0_i32 = arith.constant 0 : i32
    %c0_i32_0 = arith.constant 0 : i32
    %c0_i32_1 = arith.constant 0 : i32
    return %arg0, %c0_i32, %c0_i32_0 : i32, i32, i32
  }
  func.func @transform_2(%arg0: i32, %arg1: i32) -> (i32, i32, i32) {
    %c0_i32 = arith.constant 0 : i32
    %c0_i32_0 = arith.constant 0 : i32
    %c0_i32_1 = arith.constant 0 : i32
    return %arg0, %c0_i32, %c0_i32_0 : i32, i32, i32
  }
  func.func @transform_3(%arg0: i32, %arg1: i32) -> (i32, i32) {
    %c0_i32 = arith.constant 0 : i32
    %c0_i32_0 = arith.constant 0 : i32
    %c0_i32_1 = arith.constant 0 : i32
    return %c0_i32, %c0_i32_0 : i32, i32
  }
  func.func @transform_4(%arg0: i32, %arg1: i32) -> (i32, i32) {
    %c0_i32 = arith.constant 0 : i32
    %c0_i32_0 = arith.constant 0 : i32
    %c0_i32_1 = arith.constant 0 : i32
    return %c0_i32, %c0_i32_0 : i32, i32
  }
  func.func @transform_5(%arg0: i32, %arg1: i32) -> (i32, i32) {
    %c0_i32 = arith.constant 0 : i32
    %c0_i32_0 = arith.constant 0 : i32
    %c0_i32_1 = arith.constant 0 : i32
    return %c0_i32, %c0_i32_0 : i32, i32
  }
  func.func @transform_6(%arg0: i32, %arg1: i32) -> (i32, i32) {
    %c0_i32 = arith.constant 0 : i32
    %c0_i32_0 = arith.constant 0 : i32
    %c0_i32_1 = arith.constant 0 : i32
    return %c0_i32, %c0_i32_0 : i32, i32
  }
  func.func @transform_7(%arg0: i32, %arg1: i32) -> (i32, i32, i32) {
    %c0_i32 = arith.constant 0 : i32
    %c0_i32_0 = arith.constant 0 : i32
    return %arg0, %arg1, %c0_i32 : i32, i32, i32
  }
}

</mosaic_0001>

<bundles_post_ra>
// kernel: tpu_custom_call.1
= control target key start
LH: loop header
LB: loop body
LE: loop exit
PB: predicated region body
PF: predicated region fallthrough
CT: control target
= control target key end

     0   :  { %s1859_s0 = inlined_call_operand.hbm [shape: f32[2,8,32], index: 0, kind: input, shape index: {}]   ;;  %s1860_s1 = inlined_call_operand.hbm [shape: f32[2,8,32], index: 1, kind: input, shape index: {}]   ;;  %s1861_s2 = inlined_call_operand.hbm [shape: f32[2,8,32], index: 2, kind: input, shape index: {}]   ;;  %s1862_s3 = inlined_call_operand.hbm [shape: bf16[32,32], index: 3, kind: input, shape index: {}]   ;;  %s1863_s4 = inlined_call_operand.hbm [shape: bf16[32,32], index: 4, kind: input, shape index: {}]   ;;  %s1864_s5 = inlined_call_operand.hbm [shape: bf16[32,32], index: 5, kind: input, shape index: {}]   ;;  %s1865_s6 = inlined_call_operand.hbm [shape: bf16[32,32], index: 6, kind: input, shape index: {}]   ;;  %s1866_s7 = inlined_call_operand.hbm [shape: f32[2,8,32], index: 7, kind: output, shape index: {}]  }
   0x1   :  { %1876 = sst [smem:[#allocation25_spill]] %s1859_s0 }
   0x2   :  { %1877 = sst [smem:[#allocation26_spill]] %s1860_s1 }
   0x3   :  { %1878 = sst [smem:[#allocation27_spill]] %s1862_s3 }
   0x4   :  { %1879 = sst [smem:[#allocation28_spill]] %s1863_s4 }
   0x5   :  { %1880 = sst [smem:[#allocation29_spill]] %s1864_s5 }
   0x6   :  { %1881 = sst [smem:[#allocation30_spill]] %s1865_s6 }
   0x7   :  { %12 = vsyncpa [#allocation4], 0 }
   0x8   :  { %14 = vsyncpa [#allocation4 + $0x1], 0 }
   0x9   :  { %15 = vsyncpa [#allocation7], 0 }
   0xa   :  { %17 = vsyncpa [#allocation7 + $0x1], 0 }
   0xb   :  { %18 = vsyncpa [#allocation10], 0 }
   0xc   :  { %19 = vsyncpa [#allocation13], 0 }
   0xd   :  { %20 = vsyncpa [#allocation5], 0 }
   0xe   :  { %22 = vsyncpa [#allocation5 + $0x1], 0  ;;  %s1596_s24 = smov 0   ;;  %s1598_s25 = smov 0  }
   0xf   :  { %s1600_s26 = smov 0   ;;  %s1602_s27 = smov 0  }
  0x10   :  { %s1604_s28 = smov 0   ;;  %s1606_s29 = smov 0  }
  0x11 LB: > { %1882 = sst [smem:[#allocation21_spill]] %s1538_s28  ;;  %s1627_s30 = sadd.s32 4294967295, %s1542_s29   ;;  %s1542_s29 = sphi %s1606_s29, %s28_s29   ;;  %s1538_s28 = sphi %s1604_s28, %s1905_s28   ;;  %s1534_s27 = sphi %s1602_s27, %s1904_s27   ;;  %s1530_s26 = sphi %s1600_s26, %s1908_s26   ;;  %s1526_s25 = sphi %s1598_s25, %s1907_s25   ;;  %s1522_s24 = sphi %s1596_s24, %s1906_s24  }
  0x12   : > { %1883 = sst [smem:[#allocation22_spill]] %s1542_s29  ;;  %p1024_p0 = scmp.ge.s32.totalorder %s1542_s29, 1 }
  0x13   : > { %p63_p1 = scmp.eq.s32.totalorder %s1627_s30, 0  ;;  %p237_p2 = scmp.lt.s32.totalorder %s1542_s29, 3 }
  0x14   : > { %s1884_s3 = sld [smem:[#allocation27_spill]]  ;;  %s1544_s12 = smov [#allocation9]  }
  0x15   : > { %p1635_p3 = pnand %p1024_p0, %p237_p2  ;;  %s250_s13 = sshll.u32 %s1544_s12, 4  ;;  %s251_s13 = int_to_ptr.vmem [resolvable:$true] %s250_s13 }
  0x16   : > { %p1029_p6 = scmp.ge.s32.totalorder %s1542_s29, 2  ;;  %s1887_s5 = sld [smem:[#allocation29_spill]] }
  0x17   : > { %p1125_p4 = pneg %p1635_p3  ;;  %s1867_s18 = smov 64  }
  0x18   : > { %s1869_s19 = smov 4   ;;  %s1547_s20 = smov [#allocation12]  }
  0x19   : > { %p1643_p5 = pnand %p1125_p4, %p63_p1  ;;  %s278_s21 = sshll.u32 %s1547_s20, 4  ;;  %s279_s21 = int_to_ptr.vmem [resolvable:$true] %s278_s21 }
  0x1a   : > { %s248_s10 = sshll.u32 %s1884_s3, 4  ;;  %s1023_s22 = sadd.s32 4294967294, %s1542_s29   ;;  %s249_s10 = int_to_ptr.hbm [resolvable:$true] %s248_s10 }
  0x1b   : > { %1128 = dma.hbm_to_vmem [thread:$0]  (!%p1643_p5), %s249_s10, 256, %s251_s13, [#allocation10], %s1867_s18, %s1867_s18, %s1869_s19  }
  0x1c   : > { %s276_s17 = sshll.u32 %s1887_s5, 4  ;;  %s40_s23 = sadd.s32 1, %s1538_s28  ;;  %s277_s17 = int_to_ptr.hbm [resolvable:$true] %s276_s17 }
  0x1d   : > { %1134 = dma.hbm_to_vmem [thread:$0]  (!%p1643_p5), %s277_s17, 256, %s279_s21, [#allocation13], %s1867_s18, %s1867_s18, %s1869_s19  }
  0x1e   : > { %p42_p7 = scmp.ge.s32.totalorder %s40_s23, 2  ;;  %s49_s8 = sadd.s32 1, %s1530_s26 }
  0x1f   : > { %p56_p8 = scmp.ne.s32.totalorder %s1530_s26, %s1526_s25  ;;  %p57_p9 = scmp.eq.s32.totalorder %s1542_s29, 0 }
  0x20   : > { %s1910_s23 = smov (%p42_p7, %s40_s23), 0  ;;  %p62_p11 = scmp.ne.s32.totalorder %s1526_s25, %s1522_s24 }
  0x21   : > { %1888 = sst [smem:[#allocation23_spill]] %s1910_s23  ;;  %p1669_p10 = por %p57_p9, %p56_p8 }
  0x22   : > { %s44_s10 = ssub.s32 %s1538_s28, %s1910_s23  ;;  %p224_p12 = scmp.eq.s32.totalorder %s1627_s30, 1 }
  0x23   : > { %p47_p13 = scmp.eq.s32.totalorder %s44_s10, 0  ;;  %p1680_p0 = por %p63_p1, %p62_p11 }
  0x24   : > { %p1684_p2 = por %p224_p12, %p56_p8  ;;  %p230_p4 = scmp.eq.s32.totalorder %s1023_s22, 1 }
  0x25   : > { %s1689_s15 = scalar_select %p47_p13, %s1530_s26, %s49_s8  }
  0x26   : > { %p1691_p7 = por %p230_p4, %p62_p11  ;;  %p1156_p9 = scmp.lt.s32.totalorder %s1542_s29, 2 }
  0x27   : > { %1892 = sst [smem:[#allocation24_spill]] %s1689_s15  ;;  %s1872_s17 = sand.u32 1, %s1530_s26  }
  0x28   : > { %s1698_s20 = sshll.u32 %s1538_s28, 3  ;;  %s1702_s21 = sshll.u32 %s1872_s17, 3 }
  0x29   : > { %p1706_p8 = pnand %p1156_p9, %p1669_p10  ;;  %s326_s22 = sand.u32 1, %s1542_s29  }
  0x2a   : > { %s1895_s1 = sld [smem:[#allocation26_spill]]  ;;  %s330_s3 = scalar_lea.vmem [#allocation6], %s1702_s21 }
  0x2b   : > { %s338_s5 = sshll.u32 %s330_s3, 4  ;;  %s1896_s4 = sld [smem:[#allocation28_spill]]  ;;  %s339_s5 = int_to_ptr.vmem [resolvable:$true] %s338_s5 }
  0x2c   : > { %s327_s15 = scalar_lea.sflag [#allocation7], %s326_s22  ;;  %s1548_s29 = smov [#allocation11]  }
  0x2d   : > { %s264_s18 = sshll.u32 %s1548_s29, 4  ;;  %s1897_s6 = sld [smem:[#allocation30_spill]]  ;;  %s265_s18 = int_to_ptr.vmem [resolvable:$true] %s264_s18 }
  0x2e   : > { %s1899_s17 = smov 64   ;;  %s1549_s22 = smov [#allocation14]  }
  0x2f   : > { %s1900_s0 = sld [smem:[#allocation25_spill]]  ;;  %s310_s8 = scalar_lea.vmem [#allocation3], %s1702_s21 }
  0x30   : > { %s334_s19 = scalar_lea.hbm %s1895_s1, %s1698_s20 }
  0x31   : > { %s336_s23 = sshll.u32 %s334_s19, 4  ;;  %s262_s28 = sshll.u32 %s1896_s4, 4  ;;  %s337_s23 = int_to_ptr.hbm [resolvable:$true] %s336_s23  ;;  %s263_s28 = int_to_ptr.hbm [resolvable:$true] %s262_s28 }
  0x32   : > { %1144 = dma.hbm_to_vmem [thread:$0]  (!%p1706_p8), %s337_s23, 128, %s339_s5, %s327_s15  }
  0x33   : > { %s290_s3 = sshll.u32 %s1897_s6, 4  ;;  %s1898_s19 = smov 4   ;;  %s291_s3 = int_to_ptr.hbm [resolvable:$true] %s290_s3 }
  0x34   : > { %1131 = dma.hbm_to_vmem [thread:$0]  (!%p1643_p5), %s263_s28, 256, %s265_s18, [#allocation10], %s1899_s17, %s1899_s17, %s1898_s19  }
  0x35   : > { %s292_s5 = sshll.u32 %s1549_s22, 4  ;;  %s315_s29 = scalar_lea.hbm %s1900_s0, %s1698_s20  ;;  %s293_s5 = int_to_ptr.vmem [resolvable:$true] %s292_s5 }
  0x36   : > { %1137 = dma.hbm_to_vmem [thread:$0]  (!%p1643_p5), %s291_s3, 256, %s293_s5, [#allocation13], %s1899_s17, %s1899_s17, %s1898_s19  }
  0x37   : > { %s317_s1 = sshll.u32 %s315_s29, 4  ;;  %s319_s4 = sshll.u32 %s310_s8, 4  ;;  %s318_s1 = int_to_ptr.hbm [resolvable:$true] %s317_s1  ;;  %s320_s4 = int_to_ptr.vmem [resolvable:$true] %s319_s4 }
  0x38   : > { %s1901_s6 = sand.u32 1, %s1530_s26   ;;  %s353_s23 = scalar_lea.hbm %s1861_s2, %s1698_s20 }
  0x39   : > { %s307_s28 = scalar_lea.sflag [#allocation4], %s1901_s6  ;;  %s355_s9 = sshll.u32 %s353_s23, 4  ;;  %s356_s9 = int_to_ptr.hbm [resolvable:$true] %s355_s9 }
  0x3a   : > { %1141 = dma.hbm_to_vmem [thread:$0]  (!%p1706_p8), %s318_s1, 128, %s320_s4, %s307_s28  }
  0x3b   : > { %s349_s0 = scalar_lea.vmem [#allocation8], %s1702_s21  ;;  %366 = sbr.rel (%p1635_p3) target bundleno = 1150 (0x47e), region = 48 }
  0x3c   : > { %s357_s14 = sshll.u32 %s349_s0, 4  ;;  %s1753_s3 = sand.u32 (!%p1635_p3), 1, %s1526_s25   ;;  %s358_s14 = int_to_ptr.vmem [resolvable:$true] %s357_s14 }
  0x3d   : > { %1147 = dma.hbm_to_vmem [thread:$0]  (!%p1706_p8), %s356_s9, 128, %s358_s14, %s327_s15  }
  0x3e   : > { %s1756_s4 = sshll.u32 (!%p1635_p3), %s1753_s3, 3  ;;  %s369_s6 = scalar_lea.sflag (!%p1635_p3), [#allocation4], %s1753_s3 }
  0x3f   : > { %s372_s20 = scalar_lea.vmem (!%p1635_p3), [#allocation3], %s1756_s4 }
  0x40   : > { %1501 = dma.done.wait (%p1680_p0), %s369_s6, 128  }
  0x41   : > { %1503 = vsyncadd (%p1680_p0), %s369_s6, 4294967168  ;;  %s378_s0 = sand.u32 1, %s1627_s30   ;;  %s382_s15 = scalar_lea.vmem [#allocation6], %s1756_s4 }
  0x42   : > { %s379_s11 = scalar_lea.sflag [#allocation7], %s378_s0 }
  0x43   : > { %1505 = dma.done.wait (%p1680_p0), %s379_s11, 256  }
  0x44   : > { %1507 = vsyncadd (%p1680_p0), %s379_s11, 4294967040  ;;  %s392_s21 = scalar_lea.vmem [#allocation8], %s1756_s4 }
  0x45   : > { %1509 = dma.done.wait (%p63_p1), [#allocation10], 512  }
  0x46   : > { %1511 = vsyncadd (%p63_p1), [#allocation10], 4294966784 }
  0x47   : > { %1513 = dma.done.wait (%p63_p1), [#allocation13], 512  }
  0x48   : > { %1515 = vsyncadd (%p63_p1), [#allocation13], 4294966784  ;;  %v1094_v0 = vld [vmem:[#allocation9 + $0x8] sm:$0xff]  ;;  %v1096_v1 = vld [vmem:[#allocation11 + $0x8] sm:$0xff]  ;;  %vm477_vm0 = vcmask 261120   ;;  %vm561_vm1 = vcmask 64512  }
  0x49   : > { %v1093_v2 = vld [vmem:[#allocation9] sm:$0xff]  ;;  %487 = vmatpush.bf16.msra.mxu0 %v1094_v0  ;;  %519 = vmatpush.bf16.msra.mxu1 %v1096_v1  ;;  %v1095_v3 = vld [vmem:[#allocation11] sm:$0xff]  ;;  %s1550_s30 = smov 112   ;;  %s1551_s12 = smov 120   ;;  %v1098_v19 = vld [vmem:[#allocation12 + $0x8] sm:$0xff]  ;;  %vm596_vm2 = vcmask 1043456  }
  0x4a   : > { %v455_v4 = vld [vmem:[%s372_s20] sm:$0xff]  ;;  %v456_v5 = vld [vmem:[%s382_s15] sm:$0xff]  ;;  %s1552_s10 = smov 104   ;;  %551 = vmatpush.bf16.msra.mxu2 %v1098_v19  ;;  %s1553_s19 = smov 8   ;;  %vm683_vm3 = vcmask 130112   ;;  %vm745_vm4 = vcmask 195712  }
  0x4b   : > { %v458_v6 = vpack.c.bf16 %v455_v4, %v455_v4  ;;  %v459_v7 = vpack.c.bf16 %v456_v5, %v456_v5  ;;  %v1097_v32 = vld [vmem:[#allocation12] sm:$0xff]  ;;  %v457_v33 = vld [vmem:[%s392_s21] sm:$0xff]  ;;  %s1554_s17 = smov 24   ;;  %s1555_s5 = smov 16   ;;  %vm807_vm5 = vcmask 261312  }
  0x4c   : > { %v460_v34 = vpack.c.bf16 %v457_v33, %v457_v33  ;;  %s1090_s29 = sshll.u32 %s1534_s27, 3  ;;  %s453_s18 = scalar_lea.vmem [#allocation15], %s1756_s4 }
  0x4d   : > { %488 = vmatpush.bf16.msra.mxu0 %v1093_v2  ;;  %520 = vmatpush.bf16.msra.mxu1 %v1095_v3  ;;  %s856_s28 = scalar_lea.hbm %s1866_s7, %s1090_s29  ;;  %s858_s22 = sshll.u32 %s453_s18, 4  ;;  %s859_s22 = int_to_ptr.vmem [resolvable:$true] %s858_s22 }
  0x4e   : > { %552 = vmatpush.bf16.msra.mxu2 %v1097_v32  ;;  %s860_s23 = sshll.u32 %s856_s28, 4  ;;  %s845_s9 = scalar_lea.sflag [#allocation5], %s1753_s3  ;;  %s861_s23 = int_to_ptr.hbm [resolvable:$true] %s860_s23 }
  0x4f   : > { %s1462_s14 = sshra.s32 %s861_s23, 4  ;;  %s1468_s0 = scalar_lea.hbm %s1866_s7, 16  ;;  %s1463_s14 = int_to_ptr.hbm [resolvable:$true] %s1462_s14 }
  0x50   : > { %1053 = vmatmul.msk.bf16.vlgmr.msra.gmra.mxu0 %vm477_vm0, %v458_v6  ;;  %1062 = vmatmul.msk.bf16.vlgmr.msra.gmra.mxu1 %vm477_vm0, %v459_v7  ;;  %s1464_s6 = scalar_lea.hbm %s1463_s14, 8  ;;  %p1469_p10 = scmp.lt.s32.totalorder %s1463_s14, %s1866_s7 }
  0x51   : > { %1071 = vmatmul.msk.bf16.vlgmr.msra.gmra.mxu2 %vm477_vm0, %v460_v34  ;;  %p1465_p1 = scmp.ne.s32.totalorder %s1463_s14, %s1464_s6  ;;  %p1470_p11 = scmp.lt.s32.totalorder %s1468_s0, %s1464_s6 }
  0x53   : > { %p1466_p3 = pnand %p1465_p1, %p1684_p2  ;;  %p1471_p12 = por %p1470_p11, %p1469_p10 }
  0x55   : > { %p1467_p5 = pneg %p1466_p3 }
  0x57   : > { %p1472_p13 = pnand %p1471_p12, %p1467_p5 }
  0xcd   : > { %v490_v8 = vpop.f32.mrf.mxu0  ;;  %v522_v9 = vpop.f32.mrf.mxu1 }
  0xce   : > { %v558_v10 = vpack.c.bf16 %v490_v8, %v490_v8  ;;  %v559_v11 = vpack.c.bf16 %v522_v9, %v522_v9 }
  0xd0   : > { %v615_v12 = vunpack.c.l.b16 %v558_v10  ;;  %v620_v13 = vunpack.c.l.b16 %v559_v11  ;;  %v566_v14 = vsel %vm561_vm1, %v559_v11, 0 }
  0xd1   : > { %575 = vmatpush.bf16.xpose.msra.mxu3 %v566_v14 }
  0xd2   : > { %v616_v15 = vpack.c.b16 %v615_v12, %v615_v12  ;;  %v621_v16 = vpack.c.b16 %v620_v13, %v620_v13 }
  0xd4   : > { %687 = vrot.lane.b32.xlu1 %v621_v16, %s1550_s30  ;;  %622 = vrot.lane.b32.xlu0 %v621_v16, %s1551_s12  ;;  %v554_v49 = vpop.f32.mrf.mxu2 }
  0xd5   : > { %685 = vrot.lane.b32.xlu2 %v616_v15, %s1550_s30  ;;  %v492_v17 = vpop.f32.mrf.mxu0  ;;  %v524_v18 = vpop.f32.mrf.mxu1  ;;  %v560_v50 = vpack.c.bf16 %v554_v49, %v554_v49 }
  0xd7   : > { %v656_v51 = vunpack.c.l.b16 %v560_v50  ;;  %v598_v52 = vsel %vm596_vm2, %v560_v50, 0 }
  0xd8   : > { %1072 = vmatmul.msk.bf16.vlgmr.msra.gmra.mxu3 %vm561_vm1, %v558_v10  ;;  %607 = vmatpush.bf16.msrb.mxu0 %v598_v52 }
  0xd9   : > { %v657_v53 = vpack.c.b16 %v656_v51, %v656_v51 }
  0xdc   : > { %749 = vrot.lane.b32.xlu1 %v621_v16, %s1552_s10  ;;  %617 = vrot.lane.b32.xlu0 %v616_v15, %s1551_s12  ;;  %v556_v54 = vpop.f32.mrf.mxu2 }
  0xdd   : > { %747 = vrot.lane.b32.xlu2 %v616_v15, %s1552_s10 }
 0x12f   : > { %v686_v24 = vpop.permute.xlu2 %685 }
 0x137   : > { %v748_v30 = vpop.permute.xlu2 %747 }
 0x146   : > { %v688_v20 = vpop.permute.xlu1 %687  ;;  %v623_v21 = vpop.permute.xlu0 %622 }
 0x147   : > { %v628_v22 = vsel %vm561_vm1, %v623_v21, 0  ;;  %v693_v23 = vsel %vm561_vm1, %v688_v20, 0 }
 0x148   : > { %637 = vmatpush.bf16.xpose.msrb.mxu1 %v628_v22  ;;  %702 = vmatpush.bf16.xpose.msrb.mxu3 %v693_v23 }
 0x14e   : > { %v750_v25 = vpop.permute.xlu1 %749  ;;  %v618_v26 = vpop.permute.xlu0 %617 }
 0x14f   : > { %v755_v27 = vsel %vm561_vm1, %v750_v25, 0  ;;  %1074 = vmatmul.msk.bf16.vlgmr.msrb.gmra.mxu1 %vm561_vm1, %v618_v26  ;;  %1076 = vmatmul.msk.bf16.vlgmr.msrb.gmra.mxu3 %vm561_vm1, %v686_v24 }
 0x150   : > { %764 = vmatpush.bf16.xpose.msra.mxu1 %v755_v27 }
 0x15b   : > { %v577_v28 = vpop.f32.mrf.mxu3 }
 0x15c   : > { %v581_v29 = vsel %vm561_vm1, %v577_v28, -inf }
 0x15d   : > { %582 = vmax.xlane.f32.xlu1 %v581_v29 }
 0x15f   : > { %1078 = vmatmul.msk.bf16.vlgmr.msra.gmra.mxu1 %vm561_vm1, %v748_v30 }
 0x163   : > { %v579_v31 = vpop.f32.mrf.mxu3 }
 0x1cc   : > { %v639_v35 = vpop.f32.mrf.mxu1 }
 0x1cd   : > { %v643_v36 = vsel %vm561_vm1, %v639_v35, -inf }
 0x1ce   : > { %644 = vmax.xlane.f32.xlu0 %v643_v36 }
 0x1d0   : > { %v583_v37 = vpop.xlane.xlu1 %582 }
 0x1d1   : > { %v584_v38 = vsub.f32 %v577_v28, %v583_v37  ;;  %v1100_v37 = vld [vmem:[#allocation14 + $0x8] sm:$0xff] }
 0x1d2   : > { %v704_v39 = vpop.f32.mrf.mxu3  ;;  %836 = vmatpush.bf16.msra.mxu3 %v1100_v37 }
 0x1d3   : > { %v585_v40 = vmul.f32 1.442695, %v584_v38  ;;  %v708_v48 = vsel %vm561_vm1, %v704_v39, -inf  ;;  %v1099_v38 = vld [vmem:[#allocation14] sm:$0xff] }
 0x1d4   : > { %v641_v41 = vpop.f32.mrf.mxu1 }
 0x1d5   : > { %1222 = vpow2.f32 %v585_v40 }
 0x1d6   : > { %837 = vmatpush.bf16.msra.mxu3 %v1099_v38 }
 0x1da   : > { %v706_v42 = vpop.f32.mrf.mxu3 }
 0x1db   : > { %v1223_v43 = vpop.eup %1222 }
 0x1dc   : > { %v766_v44 = vpop.f32.mrf.mxu1  ;;  %v587_v45 = vsel %vm561_vm1, %v1223_v43, 0.0 }
 0x1dd   : > { %588 = vadd.xlane.f32.xlu1 %v587_v45  ;;  %v770_v46 = vsel %vm561_vm1, %v766_v44, -inf }
 0x1de   : > { %771 = vmax.xlane.f32.xlu2 %v770_v46 }
 0x1e4   : > { %v768_v47 = vpop.f32.mrf.mxu1 }
 0x1e6   : > { %709 = vmax.xlane.f32.xlu2 %v708_v48 }
 0x1fe   : > { %658 = vrot.lane.b32.xlu2 %v657_v53, %s1551_s12 }
 0x241   : > { %v645_v55 = vpop.xlane.xlu0 %644 }
 0x242   : > { %v646_v56 = vsub.f32 %v639_v35, %v645_v55 }
 0x244   : > { %v647_v57 = vmul.f32 1.442695, %v646_v56 }
 0x246   : > { %1224 = vpow2.f32 %v647_v57 }
 0x24c   : > { %v1225_v58 = vpop.eup %1224 }
 0x24d   : > { %v649_v59 = vsel %vm561_vm1, %v1225_v58, 0.0 }
 0x24e   : > { %650 = vadd.xlane.f32.xlu0 %v649_v59 }
 0x250   : > { %v589_v60 = vpop.xlane.xlu1 %588 }
 0x251   : > { %1226 = vrcp.f32 %v589_v60  ;;  %v772_v61 = vpop.xlane.xlu2 %771 }
 0x252   : > { %v773_v62 = vsub.f32 %v766_v44, %v772_v61 }
 0x254   : > { %v774_v63 = vmul.f32 1.442695, %v773_v62 }
 0x256   : > { %1228 = vpow2.f32 %v774_v63 }
 0x257   : > { %v1227_v0 = vpop.eup %1226 }
 0x258   : > { %v591_v1 = vmul.f32 %v1227_v0, %v1223_v43 }
 0x259   : > { %v710_v2 = vpop.xlane.xlu2 %709 }
 0x25a   : > { %v711_v3 = vsub.f32 %v704_v39, %v710_v2  ;;  %v592_v4 = vpack.c.bf16 %v591_v1, %v591_v1 }
 0x25c   : > { %v1229_v5 = vpop.eup %1228  ;;  %v712_v6 = vmul.f32 1.442695, %v711_v3  ;;  %1073 = vmatmul.msk.bf16.vlgmr.msrb.gmra.mxu0 %vm561_vm1, %v592_v4 }
 0x25d   : > { %v776_v7 = vsel %vm561_vm1, %v1229_v5, 0.0 }
 0x25e   : > { %1230 = vpow2.f32 %v712_v6  ;;  %777 = vadd.xlane.f32.xlu0 %v776_v7 }
 0x261   : > { %v659_v10 = vpop.permute.xlu2 %658 }
 0x262   : > { %v664_v11 = vsel %vm596_vm2, %v659_v10, 0 }
 0x263   : > { %673 = vmatpush.bf16.msrb.mxu2 %v664_v11 }
 0x264   : > { %v1231_v8 = vpop.eup %1230 }
 0x265   : > { %v714_v9 = vsel %vm561_vm1, %v1231_v8, 0.0 }
 0x266   : > { %715 = vadd.xlane.f32.xlu1 %v714_v9 }
 0x272   : > { %782 = vrot.lane.b32.xlu0 %v657_v53, %s1552_s10 }
 0x27f   : > { %720 = vrot.lane.b32.xlu1 %v657_v53, %s1550_s30 }
 0x2c1   : > { %v651_v12 = vpop.xlane.xlu0 %650 }
 0x2c2   : > { %1232 = vrcp.f32 %v651_v12 }
 0x2c8   : > { %v1233_v13 = vpop.eup %1232 }
 0x2c9   : > { %v653_v14 = vmul.f32 %v1233_v13, %v1225_v58 }
 0x2cb   : > { %v654_v15 = vpack.c.bf16 %v653_v14, %v653_v14 }
 0x2cd   : > { %1075 = vmatmul.msk.bf16.vlgmr.msrb.gmra.mxu2 %vm561_vm1, %v654_v15 }
 0x2d1   : > { %v778_v16 = vpop.xlane.xlu0 %777 }
 0x2d2   : > { %1234 = vrcp.f32 %v778_v16 }
 0x2d8   : > { %v1235_v18 = vpop.eup %1234 }
 0x2d9   : > { %v609_v17 = vpop.f32.mrf.mxu0  ;;  %v780_v20 = vmul.f32 %v1235_v18, %v1229_v5  ;;  %v716_v21 = vpop.xlane.xlu1 %715 }
 0x2da   : > { %613 = vst.msk [vmem:[#allocation2] sm:$0xff] %vm561_vm1, %v609_v17  ;;  %1236 = vrcp.f32 %v716_v21 }
 0x2db   : > { %v781_v24 = vpack.c.bf16 %v780_v20, %v780_v20 }
 0x2e0   : > { %v1237_v25 = vpop.eup %1236 }
 0x2e1   : > { %v611_v19 = vpop.f32.mrf.mxu0  ;;  %v718_v26 = vmul.f32 %v1237_v25, %v1231_v8 }
 0x2e3   : > { %v719_v29 = vpack.c.bf16 %v718_v26, %v718_v26 }
 0x2e4   : > { %v783_v22 = vpop.permute.xlu0 %782 }
 0x2e5   : > { %v788_v23 = vsel %vm596_vm2, %v783_v22, 0 }
 0x2e6   : > { %797 = vmatpush.bf16.msra.mxu2 %v788_v23 }
 0x2e9   : > { %1079 = vmatmul.msk.bf16.vlgmr.msra.gmra.mxu2 %vm561_vm1, %v781_v24 }
 0x2f1   : > { %v721_v27 = vpop.permute.xlu1 %720 }
 0x2f2   : > { %v726_v28 = vsel %vm596_vm2, %v721_v27, 0 }
 0x2f3   : > { %735 = vmatpush.bf16.msra.mxu0 %v726_v28 }
 0x2f6   : > { %1077 = vmatmul.msk.bf16.vlgmr.msra.gmra.mxu0 %vm561_vm1, %v719_v29 }
 0x350   : > { %v675_v30 = vpop.f32.mrf.mxu2 }
 0x351   : > { %680 = vrot.lane.b32.xlu2 %v675_v30, %s1553_s19 }
 0x358   : > { %v677_v31 = vpop.f32.mrf.mxu2 }
 0x36c   : > { %v799_v32 = vpop.f32.mrf.mxu2 }
 0x36d   : > { %804 = vrot.lane.b32.xlu2 %v799_v32, %s1554_s17 }
 0x373   : > { %v737_v33 = vpop.f32.mrf.mxu0 }
 0x374   : > { %v801_v34 = vpop.f32.mrf.mxu2  ;;  %742 = vrot.lane.b32.xlu0 %v737_v33, %s1555_s5 }
 0x37b   : > { %v739_v35 = vpop.f32.mrf.mxu0 }
 0x3ab   : > { %v681_v36 = vpop.permute.xlu2 %680 }
 0x3ac   : > { %684 = vst.msk [vmem:[#allocation2] sm:$0xff] %vm683_vm3, %v681_v36 }
 0x3c7   : > { %v805_v40 = vpop.permute.xlu2 %804 }
 0x3e6   : > { %v743_v39 = vpop.permute.xlu0 %742 }
 0x3e7   : > { %746 = vst.msk [vmem:[#allocation2] sm:$0xff] %vm745_vm4, %v743_v39 }
 0x3e8   : > { %808 = vst.msk [vmem:[#allocation2] sm:$0xff] %vm807_vm5, %v805_v40 }
 0x3ef   : > { %v809_v41 = vld [vmem:[#allocation2] sm:$0xff] }
 0x3f0   : > { %v810_v42 = vpack.c.bf16 %v809_v41, %v809_v41 }
 0x3f2   : > { %1088 = vmatmul.msk.bf16.vlgmr.msra.gmra.mxu3 %vm477_vm0, %v810_v42 }
 0x475   : > { %v839_v43 = vpop.f32.mrf.mxu3 }
 0x476   : > { %843 = vst.msk [vmem:[%s453_s18] sm:$0xff] %vm477_vm0, %v839_v43 }
 0x477   : > { %1475 = shalt.err (!%p1472_p13)
}
 0x478   : > { %1123 = dma.vmem_to_hbm [thread:$0]  (%p1684_p2), %s859_s22, 128, %s861_s23, %s845_s9  }
 0x47d   : > { %v841_v44 = vpop.f32.mrf.mxu3 }
 0x47e PF: > { %s1902_s3 = sld [smem:[#allocation22_spill]]  ;;  %s872_s15 = sand.u32 1, %s1522_s24  }
 0x47f   : > { %p1149_p0 = pnand %p1029_p6, %p1691_p7  ;;  %s873_s21 = scalar_lea.sflag [#allocation5], %s872_s15 }
 0x481   : > { %p1150_p4 = pneg %p1149_p0 }
 0x483   : > { %1517 = dma.done.wait (%p1150_p4), %s873_s21, 128  }
 0x484   : > { %1519 = vsyncadd (%p1150_p4), %s873_s21, 4294967168  ;;  %s28_s29 = sadd.s32 1, %s1902_s3   ;;  %s1903_s13 = sld [smem:[#allocation24_spill]] }
 0x485   : > { %p25_p9 = scmp.ge.s32.totalorder %s28_s29, 4   ;;  %s1904_s27 = sld [smem:[#allocation21_spill]] }
 0x486   : > { %s1905_s28 = sld [smem:[#allocation23_spill]]  ;;  %s1906_s24 = smov %s1526_s25 }
 0x487   : > { %s1907_s25 = smov %s1530_s26  ;;  %27 = sbr.rel (!%p25_p9) target bundleno = 17 (0x11), region = 133 }
 0x48a   : > { %s1908_s26 = smov %s1903_s13 }
 0x48c   :  { %879 = vsyncpa [#allocation4], 1 }
 0x48d   :  { %881 = vsyncpa [#allocation4 + $0x1], 1 }
 0x48e   :  { %882 = vsyncpa [#allocation7], 1 }
 0x48f   :  { %884 = vsyncpa [#allocation7 + $0x1], 1 }
 0x490   :  { %885 = vsyncpa [#allocation10], 1 }
 0x491   :  { %886 = vsyncpa [#allocation13], 1 }
 0x492   :  { %887 = vsyncpa [#allocation5], 1 }
 0x493   :  { %889 = vsyncpa [#allocation5 + $0x1], 1 }

</bundles_post_ra>
